<compile_context>
chip_gen: v6e
topology: v6e:2x2x1
jax: 0.10.0
libtpu: 0.0.40
codegen_flags: <defaults>
</compile_context>

<pallas_src>
import jax
import jax.numpy as jnp
from jax.experimental import pallas as pl
from jax.experimental.pallas import tpu as pltpu


HIDDEN = 128

# Cache of whether the fused (in-kernel concat) variant lowers on this toolchain.
_FUSE_CONCAT_SUPPORTED = None


def _round_up(x, m):
    return ((x + m - 1) // m) * m


def _mlp_tail(h0, b0_ref, w1_ref, b1_ref, w2_ref, b2_ref, o_ref):
    """Shared layers 0-bias/ReLU, 1, 2 given the f32 layer-0 accumulator h0."""
    # Layer 0 bias + ReLU, re-quantize to bf16 for the next MXU pass.
    h = jnp.maximum(h0 + b0_ref[...], 0.0).astype(jnp.bfloat16)

    # Layer 1: (tm, H) @ (H, H), bf16 operands, f32 accumulation.
    h = jnp.dot(h, w1_ref[...], preferred_element_type=jnp.float32)
    h = jnp.maximum(h + b1_ref[...], 0.0).astype(jnp.bfloat16)

    # Layer 2: contract over H with the batch landing on the output lanes:
    #   (1, H) . (tm, H)^T -> (1, tm)   (lane-dense, unmasked vector stores)
    out = jax.lax.dot_general(
        w2_ref[...], h,
        dimension_numbers=(((1,), (1,)), ((), ())),
        preferred_element_type=jnp.float32)
    out = out + b2_ref[0]                    # scalar bias straight from SMEM
    o_ref[...] = out.astype(o_ref.dtype)


def critic_kernel_fused(s_ref, a_ref, w0_ref, b0_ref,
                        w1_ref, b1_ref, w2_ref, b2_ref, o_ref):
    # Fuse the torch.cat in VMEM (cheap lane concat), then a single K=16 MXU
    # contraction against the full (in_dim, H) weight.
    sa = jnp.concatenate([s_ref[...], a_ref[...]], axis=-1).astype(jnp.bfloat16)
    h0 = jnp.dot(sa, w0_ref[...], preferred_element_type=jnp.float32)
    _mlp_tail(h0, b0_ref, w1_ref, b1_ref, w2_ref, b2_ref, o_ref)


def critic_kernel_split(s_ref, a_ref, w0s_ref, w0a_ref, b0_ref,
                        w1_ref, b1_ref, w2_ref, b2_ref, o_ref):
    # Fallback: concat fused as a split matmul (2 MXU pushes for layer 0).
    h0 = jnp.dot(s_ref[...].astype(jnp.bfloat16), w0s_ref[...],
                 preferred_element_type=jnp.float32)
    h0 = h0 + jnp.dot(a_ref[...].astype(jnp.bfloat16), w0a_ref[...],
                      preferred_element_type=jnp.float32)
    _mlp_tail(h0, b0_ref, w1_ref, b1_ref, w2_ref, b2_ref, o_ref)


def critic_forward(states, actions, params, *, tm=None, fuse_concat=None):
    """Pallas-fused Critic forward. Returns shape (batch,) like torch .squeeze()."""
    global _FUSE_CONCAT_SUPPORTED
    w0, b0, w1, b1, w2, b2 = params
    B, state_dim = states.shape
    Ba, actions_dim = actions.shape
    assert Ba == B, "states/actions batch mismatch"
    in_dim, H = w0.shape
    assert in_dim == state_dim + actions_dim

    # Batch tile selection:
    #  * B < 256: one grid step over the whole batch (block dims == full dims,
    #    so no (8,128) divisibility requirement, no padding).  NOTE: on v5e the
    #    sub-128 lane output of this path uses masked stores; it is the tiny-
    #    batch path so this is accepted.
    #  * B >= 256: 128-aligned tile, as large as 2048 rows (amortizes the
    #    ~0.35us/step overhead, ~few MiB VMEM), but no larger than ceil(B/2)
    #    rounded up so there are always >= 2 grid steps for v7x's two TCs.
    if tm is None:
        tm = B if B < 256 else min(2048, _round_up(pl.cdiv(B, 2), 128))
    assert tm % 128 == 0 or tm == B, (
        "tm must be a multiple of 128, or equal the batch size")

    grid = (pl.cdiv(B, tm),)

    flops = 2 * B * (in_dim * H + H * H + H)
    bytes_accessed = (4 * B * (in_dim + 1)                      # f32 acts in/out
                      + 2 * (in_dim * H + H * H + H)            # bf16 weights
                      + 4 * (2 * H + 1))                        # f32 biases

    def call(fused):
        if fused:
            kernel = critic_kernel_fused
            w0_inputs = (w0,)
            w0_specs = [pl.BlockSpec((in_dim, H), lambda i: (0, 0))]
        else:
            kernel = critic_kernel_split
            w0_inputs = (w0[:state_dim], w0[state_dim:])
            w0_specs = [pl.BlockSpec((state_dim, H), lambda i: (0, 0)),
                        pl.BlockSpec((actions_dim, H), lambda i: (0, 0))]

        out = pl.pallas_call(
            kernel,
            out_shape=jax.ShapeDtypeStruct((1, B), jnp.float32),
            grid_spec=pltpu.PrefetchScalarGridSpec(
                num_scalar_prefetch=0,
                grid=grid,
                in_specs=[
                    pl.BlockSpec((tm, state_dim), lambda i: (i, 0)),    # states
                    pl.BlockSpec((tm, actions_dim), lambda i: (i, 0)),  # actions
                    *w0_specs,                                          # W0
                    pl.BlockSpec((1, H), lambda i: (0, 0)),             # b0
                    pl.BlockSpec((H, H), lambda i: (0, 0)),             # W1
                    pl.BlockSpec((1, H), lambda i: (0, 0)),             # b1
                    pl.BlockSpec((1, H), lambda i: (0, 0)),             # W2 row
                    pl.BlockSpec(memory_space=pltpu.MemorySpace.SMEM),  # b2
                ],
                out_specs=pl.BlockSpec((1, tm), lambda i: (0, i)),      # lane-dense
            ),
            compiler_params=pltpu.CompilerParams(
                dimension_semantics=("parallel",)),
            cost_estimate=pl.CostEstimate(
                flops=flops, transcendentals=0, bytes_accessed=bytes_accessed),
        )(states, actions, *w0_inputs, b0, w1, b1, w2, b2)
        return jax.block_until_ready(out)

    if fuse_concat is None:
        if _FUSE_CONCAT_SUPPORTED is None:
            try:
                out = call(True)
                _FUSE_CONCAT_SUPPORTED = True
            except Exception:
                # Toolchain lacks unaligned minor-dim concat -> proven split path.
                _FUSE_CONCAT_SUPPORTED = False
                out = call(False)
        else:
            out = call(_FUSE_CONCAT_SUPPORTED)
    else:
        out = call(fuse_concat)

    # torch: self.model(sa).squeeze()  -> (B, 1) -> (B,)
    return out.reshape(B)


def init_params(key, state_dim, actions_dim, hidden=HIDDEN):
    """Deterministic synthetic parameters (torch-Linear init), stored as (in, out)
    so the kernel does x @ W.  Weights bf16 (MXU-native), biases f32."""
    in_dim = state_dim + actions_dim
    k0, k1, k2, k3, k4, k5 = jax.random.split(key, 6)

    def linear(kw, kb, fan_in, fan_out):
        bound = 1.0 / jnp.sqrt(fan_in)
        w = jax.random.uniform(kw, (fan_in, fan_out), jnp.float32, -bound, bound)
        b = jax.random.uniform(kb, (1, fan_out), jnp.float32, -bound, bound)
        return w, b

    w0, b0 = linear(k0, k1, in_dim, hidden)
    w1, b1 = linear(k2, k3, hidden, hidden)
    w2, b2 = linear(k4, k5, hidden, 1)
    return (w0.astype(jnp.bfloat16), b0,
            w1.astype(jnp.bfloat16), b1,
            w2.T.astype(jnp.bfloat16),      # W2 as a (1, H) row
            b2.reshape(1))                  # b2 as a (1,) scalar for SMEM


def critic_ref(states, actions, params):
    """Pure-JAX reference (PyTorch forward, same bf16-operand / f32-accum math)."""
    w0, b0, w1, b1, w2, b2 = params
    sa = jnp.concatenate([states, actions], axis=-1).astype(jnp.bfloat16)
    h = jnp.maximum(jnp.dot(sa, w0, preferred_element_type=jnp.float32) + b0, 0.0)
    h = jnp.maximum(jnp.dot(h.astype(jnp.bfloat16), w1,
                            preferred_element_type=jnp.float32) + b1, 0.0)
    out = jnp.dot(h.astype(jnp.bfloat16), w2.T,
                  preferred_element_type=jnp.float32) + b2
    return jnp.squeeze(out, axis=-1)


if __name__ == "__main__":
    key = jax.random.PRNGKey(0)
    k_params, k_states, k_actions = jax.random.split(key, 3)

    state_dim = 12
    actions_dim = 4
    params = init_params(k_params, state_dim, actions_dim)

    # Small batch: single grid step, full-batch tile.
    batch = 8
    states = jax.random.normal(k_states, (batch, state_dim), jnp.float32)
    actions = jax.random.normal(k_actions, (batch, actions_dim), jnp.float32)
    out = jax.block_until_ready(critic_forward(states, actions, params))
    ref = critic_ref(states, actions, params)
    assert out.shape == (batch,), out.shape
    assert jnp.allclose(out, ref, atol=1e-2, rtol=1e-2), (out, ref)

    # Ragged multi-tile batch: default tm -> 2 grid steps with a partial edge
    # block (exercises lane-dense output + masked edge writeback, no pad copy).
    batch2 = 300
    k_s2, k_a2 = jax.random.split(k_states)
    states2 = jax.random.normal(k_s2, (batch2, state_dim), jnp.float32)
    actions2 = jax.random.normal(k_a2, (batch2, actions_dim), jnp.float32)
    out2 = jax.block_until_ready(critic_forward(states2, actions2, params))
    ref2 = critic_ref(states2, actions2, params)
    assert out2.shape == (batch2,), out2.shape
    assert jnp.allclose(out2, ref2, atol=1e-2, rtol=1e-2), (out2, ref2)

    # Explicit user tile (3 grid steps).
    out3 = jax.block_until_ready(critic_forward(states2, actions2, params, tm=128))
    assert jnp.allclose(out3, ref2, atol=1e-2, rtol=1e-2), (out3, ref2)

    print("KERNEL_OK")
</pallas_src>

<mosaic_0001>
module attributes {stable_mosaic.version = 11 : i64} {
  func.func @critic_kernel_fused(%arg0: i32, %arg1: memref<8x12xf32, #tpu.memory_space<vmem>>, %arg2: memref<8x4xf32, #tpu.memory_space<vmem>>, %arg3: memref<16x128xbf16, #tpu.memory_space<vmem>>, %arg4: memref<1x128xf32, #tpu.memory_space<vmem>>, %arg5: memref<128x128xbf16, #tpu.memory_space<vmem>>, %arg6: memref<1x128xf32, #tpu.memory_space<vmem>>, %arg7: memref<1x128xbf16, #tpu.memory_space<vmem>>, %arg8: memref<1xf32, #tpu.memory_space<smem>>, %arg9: memref<1x8xf32, #tpu.memory_space<vmem>>) attributes {dimension_semantics = [#tpu.dimension_semantics<parallel>], iteration_bounds = array<i64: 1>, scalar_prefetch = 0 : i64, scratch_operands = 0 : i64, tpu.core_type = #tpu.core_type<tc>, window_params = [{transform_indices = @transform_0, window_bounds = array<i64: 8, 12>}, {transform_indices = @transform_1, window_bounds = array<i64: 8, 4>}, {pipeline_mode = #tpu.pipeline_mode<synchronous>, transform_indices = @transform_2, window_bounds = array<i64: 16, 128>}, {pipeline_mode = #tpu.pipeline_mode<synchronous>, transform_indices = @transform_3, window_bounds = array<i64: 1, 128>}, {pipeline_mode = #tpu.pipeline_mode<synchronous>, transform_indices = @transform_4, window_bounds = array<i64: 128, 128>}, {pipeline_mode = #tpu.pipeline_mode<synchronous>, transform_indices = @transform_5, window_bounds = array<i64: 1, 128>}, {pipeline_mode = #tpu.pipeline_mode<synchronous>, transform_indices = @transform_6, window_bounds = array<i64: 1, 128>}, {transform_indices = @transform_7, window_bounds = array<i64: 1>}, {transform_indices = @transform_8, window_bounds = array<i64: 1, 8>}]} {
    %c0 = arith.constant 0 : index
    %c0_0 = arith.constant 0 : index
    %0 = vector.load %arg1[%c0, %c0_0] : memref<8x12xf32, #tpu.memory_space<vmem>>, vector<8x12xf32>
    %c0_1 = arith.constant 0 : index
    %c0_2 = arith.constant 0 : index
    %1 = vector.load %arg2[%c0_1, %c0_2] : memref<8x4xf32, #tpu.memory_space<vmem>>, vector<8x4xf32>
    %2 = tpu.concatenate %0, %1 in 1 : vector<8x12xf32>, vector<8x4xf32> -> vector<8x16xf32>
    %3 = arith.truncf %2 : vector<8x16xf32> to vector<8x16xbf16>
    %c0_3 = arith.constant 0 : index
    %c0_4 = arith.constant 0 : index
    %4 = vector.load %arg3[%c0_3, %c0_4] : memref<16x128xbf16, #tpu.memory_space<vmem>>, vector<16x128xbf16>
    %cst = arith.constant dense<0.000000e+00> : vector<8x128xf32>
    %5 = tpu.matmul %3, %4, %cst {dimension_numbers = #tpu.dot_dimension_numbers<[1], [0], [0], [1], [0, 0, 1, 1], [], []>} : vector<8x16xbf16>, vector<16x128xbf16>, vector<8x128xf32> -> vector<8x128xf32>
    %c0_5 = arith.constant 0 : index
    %c0_6 = arith.constant 0 : index
    %6 = vector.load %arg4[%c0_5, %c0_6] : memref<1x128xf32, #tpu.memory_space<vmem>>, vector<1x128xf32>
    %7 = vector.broadcast %6 : vector<1x128xf32> to vector<8x128xf32>
    %8 = arith.addf %5, %7 : vector<8x128xf32>
    %cst_7 = arith.constant 0.000000e+00 : f32
    %9 = vector.broadcast %cst_7 : f32 to vector<8x128xf32>
    %10 = arith.maximumf %8, %9 : vector<8x128xf32>
    %11 = arith.truncf %10 : vector<8x128xf32> to vector<8x128xbf16>
    %c0_8 = arith.constant 0 : index
    %c0_9 = arith.constant 0 : index
    %12 = vector.load %arg5[%c0_8, %c0_9] : memref<128x128xbf16, #tpu.memory_space<vmem>>, vector<128x128xbf16>
    %cst_10 = arith.constant dense<0.000000e+00> : vector<8x128xf32>
    %13 = tpu.matmul %11, %12, %cst_10 {dimension_numbers = #tpu.dot_dimension_numbers<[1], [0], [0], [1], [0, 0, 1, 1], [], []>} : vector<8x128xbf16>, vector<128x128xbf16>, vector<8x128xf32> -> vector<8x128xf32>
    %c0_11 = arith.constant 0 : index
    %c0_12 = arith.constant 0 : index
    %14 = vector.load %arg6[%c0_11, %c0_12] : memref<1x128xf32, #tpu.memory_space<vmem>>, vector<1x128xf32>
    %15 = vector.broadcast %14 : vector<1x128xf32> to vector<8x128xf32>
    %16 = arith.addf %13, %15 : vector<8x128xf32>
    %cst_13 = arith.constant 0.000000e+00 : f32
    %17 = vector.broadcast %cst_13 : f32 to vector<8x128xf32>
    %18 = arith.maximumf %16, %17 : vector<8x128xf32>
    %19 = arith.truncf %18 : vector<8x128xf32> to vector<8x128xbf16>
    %c0_14 = arith.constant 0 : index
    %c0_15 = arith.constant 0 : index
    %20 = vector.load %arg7[%c0_14, %c0_15] : memref<1x128xbf16, #tpu.memory_space<vmem>>, vector<1x128xbf16>
    %cst_16 = arith.constant dense<0.000000e+00> : vector<1x8xf32>
    %21 = tpu.matmul %20, %19, %cst_16 {dimension_numbers = #tpu.dot_dimension_numbers<[1], [1], [0], [0], [0, 0, 1, 0], [], []>} : vector<1x128xbf16>, vector<8x128xbf16>, vector<1x8xf32> -> vector<1x8xf32>
    %c0_17 = arith.constant 0 : index
    %22 = memref.load %arg8[%c0_17] : memref<1xf32, #tpu.memory_space<smem>>
    %23 = vector.broadcast %22 : f32 to vector<1x8xf32>
    %24 = arith.addf %21, %23 : vector<1x8xf32>
    %c0_18 = arith.constant 0 : index
    %c0_19 = arith.constant 0 : index
    %25 = vector.load %arg9[%c0_18, %c0_19] : memref<1x8xf32, #tpu.memory_space<vmem>>, vector<1x8xf32>
    tpu.vector_store %arg9[%c0_18, %c0_19], %24 {strides = array<i32>} : memref<1x8xf32, #tpu.memory_space<vmem>>, vector<1x8xf32>,
    return
  }
  func.func @transform_0(%arg0: i32) -> (i32, i32) {
    %c0_i32 = arith.constant 0 : i32
    %c0_i32_0 = arith.constant 0 : i32
    return %arg0, %c0_i32 : i32, i32
  }
  func.func @transform_1(%arg0: i32) -> (i32, i32) {
    %c0_i32 = arith.constant 0 : i32
    %c0_i32_0 = arith.constant 0 : i32
    return %arg0, %c0_i32 : i32, i32
  }
  func.func @transform_2(%arg0: i32) -> (i32, i32) {
    %c0_i32 = arith.constant 0 : i32
    %c0_i32_0 = arith.constant 0 : i32
    %c0_i32_1 = arith.constant 0 : i32
    return %c0_i32, %c0_i32_0 : i32, i32
  }
  func.func @transform_3(%arg0: i32) -> (i32, i32) {
    %c0_i32 = arith.constant 0 : i32
    %c0_i32_0 = arith.constant 0 : i32
    %c0_i32_1 = arith.constant 0 : i32
    return %c0_i32, %c0_i32_0 : i32, i32
  }
  func.func @transform_4(%arg0: i32) -> (i32, i32) {
    %c0_i32 = arith.constant 0 : i32
    %c0_i32_0 = arith.constant 0 : i32
    %c0_i32_1 = arith.constant 0 : i32
    return %c0_i32, %c0_i32_0 : i32, i32
  }
  func.func @transform_5(%arg0: i32) -> (i32, i32) {
    %c0_i32 = arith.constant 0 : i32
    %c0_i32_0 = arith.constant 0 : i32
    %c0_i32_1 = arith.constant 0 : i32
    return %c0_i32, %c0_i32_0 : i32, i32
  }
  func.func @transform_6(%arg0: i32) -> (i32, i32) {
    %c0_i32 = arith.constant 0 : i32
    %c0_i32_0 = arith.constant 0 : i32
    %c0_i32_1 = arith.constant 0 : i32
    return %c0_i32, %c0_i32_0 : i32, i32
  }
  func.func @transform_7(%arg0: i32) -> i32 {
    %c0_i32 = arith.constant 0 : i32
    %c0_i32_0 = arith.constant 0 : i32
    return %c0_i32 : i32
  }
  func.func @transform_8(%arg0: i32) -> (i32, i32) {
    %c0_i32 = arith.constant 0 : i32
    %c0_i32_0 = arith.constant 0 : i32
    return %c0_i32, %arg0 : i32, i32
  }
}

module attributes {stable_mosaic.version = 11 : i64} {
  func.func @critic_kernel_split(%arg0: i32, %arg1: memref<8x12xf32, #tpu.memory_space<vmem>>, %arg2: memref<8x4xf32, #tpu.memory_space<vmem>>, %arg3: memref<12x128xbf16, #tpu.memory_space<vmem>>, %arg4: memref<4x128xbf16, #tpu.memory_space<vmem>>, %arg5: memref<1x128xf32, #tpu.memory_space<vmem>>, %arg6: memref<128x128xbf16, #tpu.memory_space<vmem>>, %arg7: memref<1x128xf32, #tpu.memory_space<vmem>>, %arg8: memref<1x128xbf16, #tpu.memory_space<vmem>>, %arg9: memref<1xf32, #tpu.memory_space<smem>>, %arg10: memref<1x8xf32, #tpu.memory_space<vmem>>) attributes {dimension_semantics = [#tpu.dimension_semantics<parallel>], iteration_bounds = array<i64: 1>, scalar_prefetch = 0 : i64, scratch_operands = 0 : i64, tpu.core_type = #tpu.core_type<tc>, window_params = [{transform_indices = @transform_0, window_bounds = array<i64: 8, 12>}, {transform_indices = @transform_1, window_bounds = array<i64: 8, 4>}, {pipeline_mode = #tpu.pipeline_mode<synchronous>, transform_indices = @transform_2, window_bounds = array<i64: 12, 128>}, {pipeline_mode = #tpu.pipeline_mode<synchronous>, transform_indices = @transform_3, window_bounds = array<i64: 4, 128>}, {pipeline_mode = #tpu.pipeline_mode<synchronous>, transform_indices = @transform_4, window_bounds = array<i64: 1, 128>}, {pipeline_mode = #tpu.pipeline_mode<synchronous>, transform_indices = @transform_5, window_bounds = array<i64: 128, 128>}, {pipeline_mode = #tpu.pipeline_mode<synchronous>, transform_indices = @transform_6, window_bounds = array<i64: 1, 128>}, {pipeline_mode = #tpu.pipeline_mode<synchronous>, transform_indices = @transform_7, window_bounds = array<i64: 1, 128>}, {transform_indices = @transform_8, window_bounds = array<i64: 1>}, {transform_indices = @transform_9, window_bounds = array<i64: 1, 8>}]} {
    %c0 = arith.constant 0 : index
    %c0_0 = arith.constant 0 : index
    %0 = vector.load %arg1[%c0, %c0_0] : memref<8x12xf32, #tpu.memory_space<vmem>>, vector<8x12xf32>
    %1 = arith.truncf %0 : vector<8x12xf32> to vector<8x12xbf16>
    %c0_1 = arith.constant 0 : index
    %c0_2 = arith.constant 0 : index
    %2 = vector.load %arg3[%c0_1, %c0_2] : memref<12x128xbf16, #tpu.memory_space<vmem>>, vector<12x128xbf16>
    %cst = arith.constant dense<0.000000e+00> : vector<8x128xf32>
    %3 = tpu.matmul %1, %2, %cst {dimension_numbers = #tpu.dot_dimension_numbers<[1], [0], [0], [1], [0, 0, 1, 1], [], []>} : vector<8x12xbf16>, vector<12x128xbf16>, vector<8x128xf32> -> vector<8x128xf32>
    %c0_3 = arith.constant 0 : index
    %c0_4 = arith.constant 0 : index
    %4 = vector.load %arg2[%c0_3, %c0_4] : memref<8x4xf32, #tpu.memory_space<vmem>>, vector<8x4xf32>
    %5 = arith.truncf %4 : vector<8x4xf32> to vector<8x4xbf16>
    %c0_5 = arith.constant 0 : index
    %c0_6 = arith.constant 0 : index
    %6 = vector.load %arg4[%c0_5, %c0_6] : memref<4x128xbf16, #tpu.memory_space<vmem>>, vector<4x128xbf16>
    %cst_7 = arith.constant dense<0.000000e+00> : vector<8x128xf32>
    %7 = tpu.matmul %5, %6, %cst_7 {dimension_numbers = #tpu.dot_dimension_numbers<[1], [0], [0], [1], [0, 0, 1, 1], [], []>} : vector<8x4xbf16>, vector<4x128xbf16>, vector<8x128xf32> -> vector<8x128xf32>
    %8 = arith.addf %3, %7 : vector<8x128xf32>
    %c0_8 = arith.constant 0 : index
    %c0_9 = arith.constant 0 : index
    %9 = vector.load %arg5[%c0_8, %c0_9] : memref<1x128xf32, #tpu.memory_space<vmem>>, vector<1x128xf32>
    %10 = vector.broadcast %9 : vector<1x128xf32> to vector<8x128xf32>
    %11 = arith.addf %8, %10 : vector<8x128xf32>
    %cst_10 = arith.constant 0.000000e+00 : f32
    %12 = vector.broadcast %cst_10 : f32 to vector<8x128xf32>
    %13 = arith.maximumf %11, %12 : vector<8x128xf32>
    %14 = arith.truncf %13 : vector<8x128xf32> to vector<8x128xbf16>
    %c0_11 = arith.constant 0 : index
    %c0_12 = arith.constant 0 : index
    %15 = vector.load %arg6[%c0_11, %c0_12] : memref<128x128xbf16, #tpu.memory_space<vmem>>, vector<128x128xbf16>
    %cst_13 = arith.constant dense<0.000000e+00> : vector<8x128xf32>
    %16 = tpu.matmul %14, %15, %cst_13 {dimension_numbers = #tpu.dot_dimension_numbers<[1], [0], [0], [1], [0, 0, 1, 1], [], []>} : vector<8x128xbf16>, vector<128x128xbf16>, vector<8x128xf32> -> vector<8x128xf32>
    %c0_14 = arith.constant 0 : index
    %c0_15 = arith.constant 0 : index
    %17 = vector.load %arg7[%c0_14, %c0_15] : memref<1x128xf32, #tpu.memory_space<vmem>>, vector<1x128xf32>
    %18 = vector.broadcast %17 : vector<1x128xf32> to vector<8x128xf32>
    %19 = arith.addf %16, %18 : vector<8x128xf32>
    %cst_16 = arith.constant 0.000000e+00 : f32
    %20 = vector.broadcast %cst_16 : f32 to vector<8x128xf32>
    %21 = arith.maximumf %19, %20 : vector<8x128xf32>
    %22 = arith.truncf %21 : vector<8x128xf32> to vector<8x128xbf16>
    %c0_17 = arith.constant 0 : index
    %c0_18 = arith.constant 0 : index
    %23 = vector.load %arg8[%c0_17, %c0_18] : memref<1x128xbf16, #tpu.memory_space<vmem>>, vector<1x128xbf16>
    %cst_19 = arith.constant dense<0.000000e+00> : vector<1x8xf32>
    %24 = tpu.matmul %23, %22, %cst_19 {dimension_numbers = #tpu.dot_dimension_numbers<[1], [1], [0], [0], [0, 0, 1, 0], [], []>} : vector<1x128xbf16>, vector<8x128xbf16>, vector<1x8xf32> -> vector<1x8xf32>
    %c0_20 = arith.constant 0 : index
    %25 = memref.load %arg9[%c0_20] : memref<1xf32, #tpu.memory_space<smem>>
    %26 = vector.broadcast %25 : f32 to vector<1x8xf32>
    %27 = arith.addf %24, %26 : vector<1x8xf32>
    %c0_21 = arith.constant 0 : index
    %c0_22 = arith.constant 0 : index
    %28 = vector.load %arg10[%c0_21, %c0_22] : memref<1x8xf32, #tpu.memory_space<vmem>>, vector<1x8xf32>
    tpu.vector_store %arg10[%c0_21, %c0_22], %27 {strides = array<i32>} : memref<1x8xf32, #tpu.memory_space<vmem>>, vector<1x8xf32>,
    return
  }
  func.func @transform_0(%arg0: i32) -> (i32, i32) {
    %c0_i32 = arith.constant 0 : i32
    %c0_i32_0 = arith.constant 0 : i32
    return %arg0, %c0_i32 : i32, i32
  }
  func.func @transform_1(%arg0: i32) -> (i32, i32) {
    %c0_i32 = arith.constant 0 : i32
    %c0_i32_0 = arith.constant 0 : i32
    return %arg0, %c0_i32 : i32, i32
  }
  func.func @transform_2(%arg0: i32) -> (i32, i32) {
    %c0_i32 = arith.constant 0 : i32
    %c0_i32_0 = arith.constant 0 : i32
    %c0_i32_1 = arith.constant 0 : i32
    return %c0_i32, %c0_i32_0 : i32, i32
  }
  func.func @transform_3(%arg0: i32) -> (i32, i32) {
    %c0_i32 = arith.constant 0 : i32
    %c0_i32_0 = arith.constant 0 : i32
    %c0_i32_1 = arith.constant 0 : i32
    return %c0_i32, %c0_i32_0 : i32, i32
  }
  func.func @transform_4(%arg0: i32) -> (i32, i32) {
    %c0_i32 = arith.constant 0 : i32
    %c0_i32_0 = arith.constant 0 : i32
    %c0_i32_1 = arith.constant 0 : i32
    return %c0_i32, %c0_i32_0 : i32, i32
  }
  func.func @transform_5(%arg0: i32) -> (i32, i32) {
    %c0_i32 = arith.constant 0 : i32
    %c0_i32_0 = arith.constant 0 : i32
    %c0_i32_1 = arith.constant 0 : i32
    return %c0_i32, %c0_i32_0 : i32, i32
  }
  func.func @transform_6(%arg0: i32) -> (i32, i32) {
    %c0_i32 = arith.constant 0 : i32
    %c0_i32_0 = arith.constant 0 : i32
    %c0_i32_1 = arith.constant 0 : i32
    return %c0_i32, %c0_i32_0 : i32, i32
  }
  func.func @transform_7(%arg0: i32) -> (i32, i32) {
    %c0_i32 = arith.constant 0 : i32
    %c0_i32_0 = arith.constant 0 : i32
    %c0_i32_1 = arith.constant 0 : i32
    return %c0_i32, %c0_i32_0 : i32, i32
  }
  func.func @transform_8(%arg0: i32) -> i32 {
    %c0_i32 = arith.constant 0 : i32
    %c0_i32_0 = arith.constant 0 : i32
    return %c0_i32 : i32
  }
  func.func @transform_9(%arg0: i32) -> (i32, i32) {
    %c0_i32 = arith.constant 0 : i32
    %c0_i32_0 = arith.constant 0 : i32
    return %c0_i32, %arg0 : i32, i32
  }
}

</mosaic_0001>

<bundles_post_ra>
// kernel: tpu_custom_call.1
= control target key start
LH: loop header
LB: loop body
LE: loop exit
PB: predicated region body
PF: predicated region fallthrough
CT: control target
= control target key end

     0   :  { %14 = vsyncpa [#allocation4], 0  ;;  %s488_s0 = inlined_call_operand.vmem [shape: f32[8,12], index: 0, kind: input, shape index: {}]   ;;  %s489_s1 = inlined_call_operand.vmem [shape: f32[8,4], index: 1, kind: input, shape index: {}]   ;;  %s490_s2 = inlined_call_operand.vmem [shape: bf16[16,128], index: 2, kind: input, shape index: {}]   ;;  %s491_s3 = inlined_call_operand.vmem [shape: f32[1,128], index: 3, kind: input, shape index: {}]   ;;  %s492_s4 = inlined_call_operand.hbm [shape: bf16[128,128], index: 4, kind: input, shape index: {}]   ;;  %s493_s5 = inlined_call_operand.vmem [shape: f32[1,128], index: 5, kind: input, shape index: {}]   ;;  %s494_s6 = inlined_call_operand.vmem [shape: bf16[1,128], index: 6, kind: input, shape index: {}]   ;;  %s495_s7 = inlined_call_operand.<no memory space> [shape: f32[1], index: 7, kind: input, shape index: {}]   ;;  %s496_s8 = inlined_call_operand.hbm [shape: f32[1,8], index: 8, kind: output, shape index: {}]  }
   0x1   :  { %15 = vsyncpa [#allocation5], 0  ;;  %s406_s27 = smov [#allocation3]  }
   0x2   :  { %s29_s28 = sshll.u32 %s406_s27, 4  ;;  %s30_s28 = int_to_ptr.vmem [resolvable:$true] %s29_s28 }
   0x3   :  { %s370_s29 = scalar_lea.vmem %s30_s28, 1024  ;;  %p375_p1 = scmp.lt.s32.totalorder %s30_s28, %s30_s28 }
   0x4   :  { %p371_p0 = scmp.ne.s32.totalorder %s30_s28, %s370_s29  ;;  %p376_p2 = scmp.lt.s32.totalorder %s370_s29, %s370_s29 }
   0x6   :  { %p377_p3 = por %p376_p2, %p375_p1 }
   0x8   :  { %p378_p4 = pnand %p377_p3, %p371_p0 }
   0xa   :  { %381 = shalt.err (!%p378_p4)
}
   0xb   :  { %s407_s30 = smov 64   ;;  %s408_s9 = smov 4  }
   0xc   :  { %35 = dma.hbm_to_vmem [thread:$0]  %s492_s4, 1024, %s30_s28, [#allocation4], %s407_s30, %s407_s30, %s408_s9  }
   0xd   :  { %402 = dma.done.wait [#allocation4], 1024  }
   0xe   :  { %403 = vsyncadd [#allocation4], 4294966272  ;;  %v409_v0 = vmov 0.0   ;;  %vm410_vm0 = vmmov 0   ;;  %v47_v1 = vld [vmem:[%s489_s1] sm:$0xff]  ;;  %s411_s14 = smov 12   ;;  %v231_v32 = vstv %s495_s7 }
   0xf   :  { %314 = vmatprep.subr.bf16.mxu0 %v409_v0  ;;  %316 = vmatprep.mubr.msk.bf16.mxu0 %vm410_vm0, %v409_v0  ;;  %v353_v2 = vld [vmem:[%s490_s2] sm:$0xff]   ;;  %v354_v3 = vld [vmem:[#allocation3 + $0x38] sm:$0xff]   ;;  %v355_v4 = vld [vmem:[#allocation3 + $0x30] sm:$0xff]   ;;  %vm52_vm1 = vcmask 97280   ;;  %vm70_vm2 = vcmask 130048   ;;  %s412_s22 = smov [#allocation6]  }
  0x10   :  { %320 = vmatprep.subr.bf16.mxu1 %v409_v0  ;;  %336 = vmatprep.mubr.msk.bf16.mxu1 %vm410_vm0, %v409_v0  ;;  %v356_v5 = vld [vmem:[#allocation3 + $0x28] sm:$0xff]   ;;  %v357_v6 = vld [vmem:[#allocation3 + $0x20] sm:$0xff]   ;;  %v358_v7 = vld [vmem:[#allocation3 + $0x18] sm:$0xff]   ;;  %s280_s23 = sshll.u32 %s412_s22, 4  ;;  %vm272_vm3 = vcmask 57344   ;;  %s281_s23 = int_to_ptr.vmem [resolvable:$true] %s280_s23 }
  0x11   :  { %49 = vrot.lane.b32.xlu0 %v47_v1, %s411_s14  ;;  %315 = vmatpush3.bf16.msra.mxu0 %v353_v2  ;;  %v359_v8 = vld [vmem:[#allocation3 + $0x10] sm:$0xff]   ;;  %v46_v9 = vld [vmem:[%s488_s0] sm:$0xff]  ;;  %v360_v13 = vld [vmem:[#allocation3 + $0x8] sm:$0xff]   ;;  %s386_s24 = scalar_lea.vmem %s281_s23, 32  ;;  %p387_p6 = scmp.lt.s32.totalorder %s281_s23, %s281_s23 }
  0x12   :  { %321 = vmatpush3.bf16.msra.mxu1 %v354_v3  ;;  %340 = vmatprep.subr.bf16.mxu0 %v409_v0  ;;  %v361_v14 = vld [vmem:[#allocation3] sm:$0xff]  }
  0x13   :  { %322 = vmatprep.subr.bf16.mxu1 %v409_v0  ;;  %v289_v15 = vld [vmem:[%s491_s3] ss:$0 sm:$0xff] }
  0x14   :  { %v292_v23 = vld [vmem:[%s493_s5] ss:$0 sm:$0xff]  ;;  %s382_s5 = scalar_lea.vmem %s281_s23, 16 }
  0x15   :  { %v229_v31 = vld [vmem:[%s494_s6] sm:$0x1]  ;;  %p383_p5 = scmp.ne.s32.totalorder %s281_s23, %s382_s5  ;;  %p388_p7 = scmp.lt.s32.totalorder %s386_s24, %s382_s5 }
  0x16   :  { %323 = vmatpush3.bf16.msra.mxu1 %v355_v4 }
  0x17   :  { %324 = vmatprep.subr.bf16.mxu1 %v409_v0  ;;  %p389_p8 = por %p388_p7, %p387_p6 }
  0x19   :  { %p390_p9 = pnand %p389_p8, %p383_p5 }
  0x1a   :  { %325 = vmatpush3.bf16.msra.mxu1 %v356_v5 }
  0x1b   :  { %326 = vmatprep.subr.bf16.mxu1 %v409_v0 }
  0x1e   :  { %327 = vmatpush3.bf16.msra.mxu1 %v357_v6 }
  0x1f   :  { %328 = vmatprep.subr.bf16.mxu1 %v409_v0 }
  0x22   :  { %329 = vmatpush3.bf16.msra.mxu1 %v358_v7 }
  0x23   :  { %330 = vmatprep.subr.bf16.mxu1 %v409_v0 }
  0x26   :  { %331 = vmatpush3.bf16.msra.mxu1 %v359_v8 }
  0x27   :  { %332 = vmatprep.subr.bf16.mxu1 %v409_v0 }
  0x2a   :  { %333 = vmatpush3.bf16.msra.mxu1 %v360_v13 }
  0x2b   :  { %334 = vmatprep.subr.bf16.mxu1 %v409_v0 }
  0x2e   :  { %335 = vmatpush3.bf16.msra.mxu1 %v361_v14 }
  0x83   :  { %v50_v10 = vpop.permute.xlu0 %49 }
  0x84   :  { %v53_v11 = vsel %vm52_vm1, %v46_v9, %v50_v10 }
  0x85   :  { %v54_v12 = vpack.c.bf16 %v53_v11, %v53_v11 }
  0x87   :  { %317 = vmatmul.mubr.msk.bf16.vlgmr.msra.gmra.mxu0 %vm70_vm2, %v54_v12 }
  0x88   :  { %342 = vmatprep.mubr.msk.bf16.mxu0 %vm410_vm0, %v409_v0 }
 0x147   :  { %v108_v16 = vpop.f32.mrf.mxu0 }
 0x148   :  { %v109_v17 = vadd.f32 %v289_v15, %v108_v16 }
 0x149   :  { %v318_v18 = vpop.f32.mrf.mxu0 }
 0x14a   :  { %v114_v19 = vmax.f32 %v109_v17, 0.0 }
 0x14b   :  { %v111_v20 = vpop.f32.mrf.mxu0 }
 0x14c   :  { %v115_v21 = vpack.c.bf16 %v114_v19, %v114_v19 }
 0x14d   :  { %v319_v22 = vpop.f32.mrf.mxu0 }
 0x14e   :  { %337 = vmatmul.mubr.bf16.vlgmr.msra.gmra.mxu1 %v115_v21 }
 0x20e   :  { %v221_v24 = vpop.f32.mrf.mxu1 }
 0x20f   :  { %v222_v25 = vadd.f32 %v292_v23, %v221_v24 }
 0x210   :  { %v338_v26 = vpop.f32.mrf.mxu1 }
 0x211   :  { %v227_v27 = vmax.f32 %v222_v25, 0.0 }
 0x212   :  { %v224_v28 = vpop.f32.mrf.mxu1 }
 0x213   :  { %v228_v29 = vpack.c.bf16 %v227_v27, %v227_v27 }
 0x214   :  { %v339_v30 = vpop.f32.mrf.mxu1 }
 0x215   :  { %341 = vmatpush3.bf16.xpose.msra.mxu0 %v228_v29 }
 0x21c   :  { %343 = vmatmul.mubr.bf16.vlgmr.msra.gmra.mxu0 %v229_v31 }
 0x2dc   :  { %v266_v33 = vpop.f32.mrf.mxu0 }
 0x2dd   :  { %v267_v34 = vadd.f32 %v266_v33, %v231_v32 }
 0x2de   :  { %v344_v35 = vpop.f32.mrf.mxu0 }
 0x2df   :  { %273 = vst.msk [vmem:[#allocation6] sm:$0x1] %vm272_vm3, %v267_v34 }
 0x2e0   :  { %v269_v36 = vpop.f32.mrf.mxu0 }
 0x2e1   :  { %393 = shalt.err (!%p390_p9)
}
 0x2e2   :  { %283 = dma.vmem_to_hbm [thread:$0]  %s281_s23, 16, %s496_s8, [#allocation5]   ;;  %v345_v37 = vpop.f32.mrf.mxu0 }
 0x2e3   :  { %404 = dma.done.wait [#allocation5], 16  }
 0x2e4   :  { %405 = vsyncadd [#allocation5], 4294967280 }
 0x2e5   :  { %287 = vsyncpa [#allocation4], 1 }
 0x2e6   :  { %288 = vsyncpa [#allocation5], 1 }

// kernel: tpu_custom_call.1
= control target key start
LH: loop header
LB: loop body
LE: loop exit
PB: predicated region body
PF: predicated region fallthrough
CT: control target
= control target key end

     0   :  { %15 = vsyncpa [#allocation4], 0  ;;  %s555_s0 = inlined_call_operand.vmem [shape: f32[8,12], index: 0, kind: input, shape index: {}]   ;;  %s556_s1 = inlined_call_operand.vmem [shape: f32[8,4], index: 1, kind: input, shape index: {}]   ;;  %s557_s2 = inlined_call_operand.vmem [shape: bf16[12,128], index: 2, kind: input, shape index: {}]   ;;  %s558_s3 = inlined_call_operand.vmem [shape: bf16[4,128], index: 3, kind: input, shape index: {}]   ;;  %s559_s4 = inlined_call_operand.vmem [shape: f32[1,128], index: 4, kind: input, shape index: {}]   ;;  %s560_s5 = inlined_call_operand.hbm [shape: bf16[128,128], index: 5, kind: input, shape index: {}]   ;;  %s561_s6 = inlined_call_operand.vmem [shape: f32[1,128], index: 6, kind: input, shape index: {}]   ;;  %s562_s7 = inlined_call_operand.vmem [shape: bf16[1,128], index: 7, kind: input, shape index: {}]   ;;  %s563_s8 = inlined_call_operand.<no memory space> [shape: f32[1], index: 8, kind: input, shape index: {}]   ;;  %s564_s9 = inlined_call_operand.hbm [shape: f32[1,8], index: 9, kind: output, shape index: {}]  }
   0x1   :  { %16 = vsyncpa [#allocation5], 0  ;;  %s465_s30 = smov [#allocation3]  }
   0x2   :  { %s32_s10 = sshll.u32 %s465_s30, 4  ;;  %s33_s10 = int_to_ptr.vmem [resolvable:$true] %s32_s10 }
   0x3   :  { %s429_s11 = scalar_lea.vmem %s33_s10, 1024  ;;  %p434_p1 = scmp.lt.s32.totalorder %s33_s10, %s33_s10 }
   0x4   :  { %p430_p0 = scmp.ne.s32.totalorder %s33_s10, %s429_s11  ;;  %p435_p2 = scmp.lt.s32.totalorder %s429_s11, %s429_s11 }
   0x6   :  { %p436_p3 = por %p435_p2, %p434_p1 }
   0x8   :  { %p437_p4 = pnand %p436_p3, %p430_p0 }
   0xa   :  { %440 = shalt.err (!%p437_p4)
}
   0xb   :  { %s466_s12 = smov 64   ;;  %s467_s13 = smov 4  }
   0xc   :  { %38 = dma.hbm_to_vmem [thread:$0]  %s560_s5, 1024, %s33_s10, [#allocation4], %s466_s12, %s466_s12, %s467_s13  }
   0xd   :  { %461 = dma.done.wait [#allocation4], 1024  }
   0xe   :  { %462 = vsyncadd [#allocation4], 4294966272  ;;  %v468_v0 = vmov 0.0   ;;  %vm469_vm0 = vmmov 0   ;;  %vm60_vm1 = vcmask 1041408   ;;  %v53_v2 = vld [vmem:[%s556_s1] sm:$0xff]  ;;  %v282_v39 = vstv %s563_s8 }
   0xf   :  { %368 = vmatprep.subr.bf16.mxu1 %v468_v0  ;;  %370 = vmatprep.mubr.msk.bf16.mxu1 %vm469_vm0, %v468_v0  ;;  %v55_v1 = vld [vmem:[%s558_s3] sm:$0x3]  ;;  %vm113_vm2 = vcmask 1045504   ;;  %v54_v4 = vpack.c.bf16 %v53_v2, %v53_v2  ;;  %vm56_vm3 = vcmask 31744   ;;  %v413_v6 = vld [vmem:[#allocation3 + $0x38] sm:$0xff]   ;;  %v414_v8 = vld [vmem:[#allocation3 + $0x30] sm:$0xff]  }
  0x10   :  { %380 = vmatprep.subr.bf16.mxu0 %v468_v0  ;;  %396 = vmatprep.mubr.msk.bf16.mxu0 %vm469_vm0, %v468_v0  ;;  %v62_v3 = vsel %vm60_vm1, %v55_v1, 0  ;;  %v412_v5 = vld [vmem:[%s557_s2] sm:$0x3f]   ;;  %v415_v10 = vld [vmem:[#allocation3 + $0x28] sm:$0xff]   ;;  %vm109_vm4 = vcmask 97280   ;;  %v417_v13 = vld [vmem:[#allocation3 + $0x18] sm:$0xff]  }
  0x11   :  { %369 = vmatpush3.bf16.msra.mxu1 %v62_v3  ;;  %v115_v7 = vsel %vm113_vm2, %v412_v5, 0  ;;  %381 = vmatpush3.bf16.msra.mxu0 %v413_v6  ;;  %v49_v9 = vld [vmem:[%s555_s0] sm:$0xff]  ;;  %v418_v14 = vld [vmem:[#allocation3 + $0x10] sm:$0xff]   ;;  %v419_v15 = vld [vmem:[#allocation3 + $0x8] sm:$0xff]   ;;  %s470_s26 = smov [#allocation6]   ;;  %vm323_vm5 = vcmask 57344  }
  0x12   :  { %374 = vmatprep.subr.bf16.mxu1 %v468_v0  ;;  %382 = vmatprep.subr.bf16.mxu0 %v468_v0  ;;  %v50_v11 = vpack.c.bf16 %v49_v9, %v49_v9  ;;  %v416_v12 = vld [vmem:[#allocation3 + $0x20] sm:$0xff]   ;;  %s331_s27 = sshll.u32 %s470_s26, 4  ;;  %s332_s27 = int_to_ptr.vmem [resolvable:$true] %s331_s27 }
  0x13   :  { %v420_v16 = vld [vmem:[#allocation3] sm:$0xff]   ;;  %s445_s28 = scalar_lea.vmem %s332_s27, 32  ;;  %p446_p6 = scmp.lt.s32.totalorder %s332_s27, %s332_s27 }
  0x14   :  { %371 = vmatmul.mubr.msk.bf16.vlgmr.msra.gmra.mxu1 %vm56_vm3, %v54_v4  ;;  %v343_v22 = vld [vmem:[%s559_s4] ss:$0 sm:$0xff] }
  0x15   :  { %375 = vmatpush3.bf16.msra.mxu1 %v115_v7  ;;  %376 = vmatprep.mubr.msk.bf16.mxu1 %vm469_vm0, %v468_v0  ;;  %v344_v30 = vld [vmem:[%s561_s6] ss:$0 sm:$0xff]  ;;  %s441_s6 = scalar_lea.vmem %s332_s27, 16 }
  0x16   :  { %400 = vmatprep.subr.bf16.mxu1 %v468_v0  ;;  %383 = vmatpush3.bf16.msra.mxu0 %v414_v8  ;;  %v280_v38 = vld [vmem:[%s562_s7] sm:$0x1]  ;;  %p442_p5 = scmp.ne.s32.totalorder %s332_s27, %s441_s6  ;;  %p447_p7 = scmp.lt.s32.totalorder %s445_s28, %s441_s6 }
  0x17   :  { %384 = vmatprep.subr.bf16.mxu0 %v468_v0 }
  0x18   :  { %p448_p8 = por %p447_p7, %p446_p6 }
  0x1a   :  { %385 = vmatpush3.bf16.msra.mxu0 %v415_v10  ;;  %p449_p9 = pnand %p448_p8, %p442_p5 }
  0x1b   :  { %386 = vmatprep.subr.bf16.mxu0 %v468_v0 }
  0x1c   :  { %377 = vmatmul.mubr.msk.bf16.vlgmr.msra.gmra.mxu1 %vm109_vm4, %v50_v11 }
  0x1d   :  { %402 = vmatprep.mubr.msk.bf16.mxu1 %vm469_vm0, %v468_v0 }
  0x1e   :  { %387 = vmatpush3.bf16.msra.mxu0 %v416_v12 }
  0x1f   :  { %388 = vmatprep.subr.bf16.mxu0 %v468_v0 }
  0x22   :  { %389 = vmatpush3.bf16.msra.mxu0 %v417_v13 }
  0x23   :  { %390 = vmatprep.subr.bf16.mxu0 %v468_v0 }
  0x26   :  { %391 = vmatpush3.bf16.msra.mxu0 %v418_v14 }
  0x27   :  { %392 = vmatprep.subr.bf16.mxu0 %v468_v0 }
  0x2a   :  { %393 = vmatpush3.bf16.msra.mxu0 %v419_v15 }
  0x2b   :  { %394 = vmatprep.subr.bf16.mxu0 %v468_v0 }
  0x2e   :  { %395 = vmatpush3.bf16.msra.mxu0 %v420_v16 }
  0xd4   :  { %v98_v17 = vpop.f32.mrf.mxu1 }
  0xd6   :  { %v372_v18 = vpop.f32.mrf.mxu1 }
  0xd8   :  { %v101_v19 = vpop.f32.mrf.mxu1 }
  0xda   :  { %v373_v20 = vpop.f32.mrf.mxu1 }
  0xdc   :  { %v151_v21 = vpop.f32.mrf.mxu1 }
  0xdd   :  { %v152_v23 = vadd.f32 %v151_v21, %v98_v17 }
  0xde   :  { %v378_v24 = vpop.f32.mrf.mxu1 }
  0xdf   :  { %v164_v25 = vadd.f32 %v343_v22, %v152_v23 }
  0xe0   :  { %v154_v26 = vpop.f32.mrf.mxu1 }
  0xe1   :  { %v165_v27 = vmax.f32 %v164_v25, 0.0 }
  0xe2   :  { %v379_v28 = vpop.f32.mrf.mxu1 }
  0xe3   :  { %v166_v29 = vpack.c.bf16 %v165_v27, %v165_v27 }
  0xe5   :  { %397 = vmatmul.mubr.bf16.vlgmr.msra.gmra.mxu0 %v166_v29 }
 0x1a5   :  { %v272_v31 = vpop.f32.mrf.mxu0 }
 0x1a6   :  { %v273_v32 = vadd.f32 %v344_v30, %v272_v31 }
 0x1a7   :  { %v398_v33 = vpop.f32.mrf.mxu0 }
 0x1a8   :  { %v278_v34 = vmax.f32 %v273_v32, 0.0 }
 0x1a9   :  { %v275_v35 = vpop.f32.mrf.mxu0 }
 0x1aa   :  { %v279_v36 = vpack.c.bf16 %v278_v34, %v278_v34 }
 0x1ab   :  { %v399_v37 = vpop.f32.mrf.mxu0 }
 0x1ac   :  { %401 = vmatpush3.bf16.xpose.msra.mxu1 %v279_v36 }
 0x1b3   :  { %403 = vmatmul.mubr.bf16.vlgmr.msra.gmra.mxu1 %v280_v38 }
 0x273   :  { %v317_v40 = vpop.f32.mrf.mxu1 }
 0x274   :  { %v318_v41 = vadd.f32 %v317_v40, %v282_v39 }
 0x275   :  { %v404_v42 = vpop.f32.mrf.mxu1 }
 0x276   :  { %324 = vst.msk [vmem:[#allocation6] sm:$0x1] %vm323_vm5, %v318_v41 }
 0x277   :  { %v320_v43 = vpop.f32.mrf.mxu1 }
 0x278   :  { %452 = shalt.err (!%p449_p9)
}
 0x279   :  { %334 = dma.vmem_to_hbm [thread:$0]  %s332_s27, 16, %s564_s9, [#allocation5]   ;;  %v405_v44 = vpop.f32.mrf.mxu1 }
 0x27a   :  { %463 = dma.done.wait [#allocation5], 16  }
 0x27b   :  { %464 = vsyncadd [#allocation5], 4294967280 }
 0x27c   :  { %338 = vsyncpa [#allocation4], 1 }
 0x27d   :  { %339 = vsyncpa [#allocation5], 1 }

</bundles_post_ra>
